<compile_context>
chip_gen: v5e
topology: v5e:2x2
jax: 0.10.0
libtpu: 0.0.40
codegen_flags: <defaults>
</compile_context>

<pallas_src>
import functools

import jax
import jax.numpy as jnp
from jax.experimental import pallas as pl
from jax.experimental.pallas import tpu as pltpu

# Synthetic "param" configuration (param.dimx / dima / dimb from utils_meta).
DIMX = 2
DIMA = 2
DIMB = 2
HIDDEN = 20

LANE_CHUNK = 4096          # in-kernel lane sub-chunk (review: 2048-8192)
TB_MAX = 65536             # batch-tile cap: ~1.6 MB HBM/step, ~12 MB streamed VMEM
TARGET_STEPS = 2           # keep >=2 grid steps so both v7x TensorCores get work
VMEM_LIMIT_BYTES = 48 * 1024 * 1024   # > 16/32 MiB scoped defaults, < v7x 64 MiB phys


def _cdiv(a, b):
    return -(-a // b)


def _round_up(n, m):
    return _cdiv(n, m) * m


def _pick_tile(batch):
    """Batch-tile (lane) size: big enough to amortize per-step overhead,
    small enough for VMEM, >= TARGET_STEPS grid steps, modest padding."""
    steps = max(TARGET_STEPS, _cdiv(batch, TB_MAX))
    tb = _cdiv(batch, steps)
    grain = LANE_CHUNK if tb > LANE_CHUNK else 128
    return min(_round_up(max(tb, 1), grain), TB_MAX)


def _brnet_kernel(xT_ref, aT_ref, w1x_ref, w1a_ref, b1_ref, w2_ref, b2_ref,
                  w3_ref, b3_ref, o_ref, *, chunk):
    """Batch-on-lanes MLP: every activation tile is (features, batch_tile)."""
    # VMEM-resident weights (constant index_map), loaded once per grid step.
    w1x = w1x_ref[...]                     # (H, dimx)  f32
    w1a = w1a_ref[...]                     # (H, dima)  f32
    b1 = b1_ref[...]                       # (H, 1)     f32
    w2 = w2_ref[...]                       # (H, H)     bf16 (MXU operand)
    b2 = b2_ref[...]                       # (H, 1)     f32
    w3 = w3_ref[...]                       # (dimb, H)  f32
    b3 = b3_ref[...]                       # (dimb, 1)  f32

    dimx = xT_ref.shape[0]
    dima = aT_ref.shape[0]
    hidden = w2_ref.shape[0]
    tb = o_ref.shape[-1]
    n_sub = tb // chunk

    # Static lane sub-chunk loop (zero-cost static slices): the (H, chunk)
    # intermediates stay small so the full (H, tb) activations never
    # materialize in VMEM even at 64K-lane tiles.
    for c in range(n_sub):
        sl = slice(c * chunk, (c + 1) * chunk)
        xs = xT_ref[:, sl]                 # (dimx, chunk) f32
        az = aT_ref[:, sl]                 # (dima, chunk) f32

        # Layer 1 (K = dimx + dima = 4): broadcast-FMA chain on the VPU —
        # far too skinny to be worth an MXU staging pass.
        h1 = w1x[:, 0:1] * xs[0:1, :]
        for k in range(1, dimx):
            h1 = h1 + w1x[:, k:k + 1] * xs[k:k + 1, :]
        for k in range(dima):
            h1 = h1 + w1a[:, k:k + 1] * az[k:k + 1, :]
        h1 = jnp.maximum(h1 + b1, 0.0)                      # (H, chunk) f32

        # Layer 2 (20x20): the only matmul worth the MXU.  bf16 operands,
        # f32 accumulation -> single-pass MXU instead of f32xf32 multi-pass.
        h2 = jnp.dot(w2, h1.astype(jnp.bfloat16),
                     preferred_element_type=jnp.float32)
        h2 = jnp.maximum(h2 + b2, 0.0)                      # (H, chunk) f32

        # Layer 3 (M = dimb = 2): again a VPU broadcast-FMA chain.
        out = w3[:, 0:1] * h2[0:1, :]
        for k in range(1, hidden):
            out = out + w3[:, k:k + 1] * h2[k:k + 1, :]
        o_ref[:, sl] = (out + b3).astype(o_ref.dtype)       # lane-dense store


def brnet_forward(x, a, params, *, transposed_output=False):
    """BRNet.forward.  x: (B, dimx) or (dimx,);  a: (B, dima) or (dima,).
    params (torch nn.Linear layout): w1 (H, dimx+dima), b1 (H,), w2 (H, H),
    b2 (H,), w3 (dimb, H), b3 (dimb,).  Returns (B, dimb) (or (dimb,) for 1-D
    inputs).  transposed_output=True returns the kernel-native (dimb, B_pad)
    slab so a consumer can skip the final transpose/slice."""
    squeeze = x.ndim == 1
    if squeeze:
        x = x[None, :]
        a = a[None, :]

    B, dimx = x.shape
    dima = a.shape[1]
    hidden = params["w1"].shape[0]
    dimb = params["w3"].shape[0]

    tb = _pick_tile(B)
    chunk = LANE_CHUNK if (tb % LANE_CHUNK == 0) else tb
    b_pad = _round_up(B, tb)
    grid = (b_pad // tb,)

    # Batch-on-lanes (features, batch).  The two skinny transposes (+pad) are
    # the only remaining wrapper-side HBM passes: the concat is gone (W1 is
    # split per input) and the output transpose/slice is optional.
    # TODO(synk): for a fully fused path the producer should emit x/a already
    # batch-minor and the consumer should take the (dimb, B) slab directly.
    xT = x.astype(jnp.float32).T
    aT = a.astype(jnp.float32).T
    if b_pad != B:
        xT = jnp.pad(xT, ((0, 0), (0, b_pad - B)))
        aT = jnp.pad(aT, ((0, 0), (0, b_pad - B)))

    w1 = params["w1"].astype(jnp.float32)
    w1x = w1[:, :dimx]                                # (H, dimx)
    w1a = w1[:, dimx:]                                # (H, dima)
    b1 = params["b1"].astype(jnp.float32).reshape(hidden, 1)
    w2 = params["w2"].astype(jnp.bfloat16)            # MXU operand
    b2 = params["b2"].astype(jnp.float32).reshape(hidden, 1)
    w3 = params["w3"].astype(jnp.float32)
    b3 = params["b3"].astype(jnp.float32).reshape(dimb, 1)

    def stream(shape):
        return pl.BlockSpec(shape, lambda i: (0, i))      # one tile per step

    def resident(shape):
        return pl.BlockSpec(shape, lambda i: (0, 0))      # loaded once, stays

    din = dimx + dima
    cost = pl.CostEstimate(
        flops=2 * b_pad * (din * hidden + hidden * hidden + hidden * dimb),
        transcendentals=0,
        bytes_accessed=4 * b_pad * (din + dimb)
        + 4 * (w1.size + w3.size + 2 * hidden + dimb) + 2 * w2.size)

    outT = pl.pallas_call(
        functools.partial(_brnet_kernel, chunk=chunk),
        out_shape=jax.ShapeDtypeStruct((dimb, b_pad), jnp.float32),
        grid=grid,
        in_specs=[
            stream((dimx, tb)),          # xT (streamed, double-buffered)
            stream((dima, tb)),          # aT
            resident((hidden, dimx)),    # w1x
            resident((hidden, dima)),    # w1a
            resident((hidden, 1)),       # b1
            resident((hidden, hidden)),  # w2 (bf16)
            resident((hidden, 1)),       # b2
            resident((dimb, hidden)),    # w3
            resident((dimb, 1)),         # b3
        ],
        out_specs=stream((dimb, tb)),
        compiler_params=pltpu.CompilerParams(
            dimension_semantics=("parallel",),
            vmem_limit_bytes=VMEM_LIMIT_BYTES),
        cost_estimate=cost,
    )(xT, aT, w1x, w1a, b1, w2, b2, w3, b3)

    if transposed_output:
        return outT                                    # (dimb, b_pad)
    out = outT[:, :B].T                                # (B, dimb)
    return out[0] if squeeze else out


def init_params(key):
    """Deterministic init mirroring the module: normal(mean=0, std=0.1)."""
    k1, k2, k3, k4, k5, k6 = jax.random.split(key, 6)
    std = 0.1
    return {
        "w1": std * jax.random.normal(k1, (HIDDEN, DIMX + DIMA), jnp.float32),
        "b1": std * jax.random.normal(k2, (HIDDEN,), jnp.float32),
        "w2": std * jax.random.normal(k3, (HIDDEN, HIDDEN), jnp.float32),
        "b2": std * jax.random.normal(k4, (HIDDEN,), jnp.float32),
        "w3": std * jax.random.normal(k5, (DIMB, HIDDEN), jnp.float32),
        "b3": std * jax.random.normal(k6, (DIMB,), jnp.float32),
    }


def brnet_reference(x, a, params):
    """Pure-JAX f32 reference of the torch forward (batched branch)."""
    y = jnp.concatenate([x, a], axis=1)
    y = jnp.maximum(y @ params["w1"].T + params["b1"], 0.0)
    y = jnp.maximum(y @ params["w2"].T + params["b2"], 0.0)
    return y @ params["w3"].T + params["b3"]


if __name__ == "__main__":
    key = jax.random.PRNGKey(0)
    kp, kx, ka = jax.random.split(key, 3)
    params = init_params(kp)

    B = 8
    x = jax.random.normal(kx, (B, DIMX), jnp.float32)
    a = jax.random.normal(ka, (B, DIMA), jnp.float32)

    fwd = jax.jit(brnet_forward)
    out = jax.block_until_ready(fwd(x, a, params))
    ref = brnet_reference(x, a, params)
    assert out.shape == (B, DIMB)
    # Layer 2 runs with bf16 MXU operands (f32 accumulation) -> relaxed tol.
    assert jnp.allclose(out, ref, atol=1e-2, rtol=1e-2)

    # 1-D (unbatched) branch of the torch forward.
    out1 = jax.block_until_ready(fwd(x[0], a[0], params))
    assert out1.shape == (DIMB,)
    assert jnp.allclose(out1, ref[0], atol=1e-2, rtol=1e-2)

    # Larger, non-tile-aligned batch exercising padding + the 2-step grid.
    kx2, ka2 = jax.random.split(jax.random.PRNGKey(1))
    B2 = 2000
    x2 = jax.random.normal(kx2, (B2, DIMX), jnp.float32)
    a2 = jax.random.normal(ka2, (B2, DIMA), jnp.float32)
    out2 = jax.block_until_ready(fwd(x2, a2, params))
    assert jnp.allclose(out2, brnet_reference(x2, a2, params),
                        atol=1e-2, rtol=1e-2)

    # TODO(synk): compute_input_jac / get_* helpers are host-side torch hook /
    # parameter-dict utilities, not part of the forward kernel.
    print("KERNEL_OK")
</pallas_src>

<mosaic_0001>
module attributes {stable_mosaic.version = 11 : i64} {
  func.func @_brnet_kernel(%arg0: i32, %arg1: memref<2x128xf32, #tpu.memory_space<vmem>>, %arg2: memref<2x128xf32, #tpu.memory_space<vmem>>, %arg3: memref<20x2xf32, #tpu.memory_space<vmem>>, %arg4: memref<20x2xf32, #tpu.memory_space<vmem>>, %arg5: memref<20x1xf32, #tpu.memory_space<vmem>>, %arg6: memref<20x20xbf16, #tpu.memory_space<vmem>>, %arg7: memref<20x1xf32, #tpu.memory_space<vmem>>, %arg8: memref<2x20xf32, #tpu.memory_space<vmem>>, %arg9: memref<2x1xf32, #tpu.memory_space<vmem>>, %arg10: memref<2x128xf32, #tpu.memory_space<vmem>>) attributes {dimension_semantics = [#tpu.dimension_semantics<parallel>], iteration_bounds = array<i64: 1>, scalar_prefetch = 0 : i64, scratch_operands = 0 : i64, tpu.core_type = #tpu.core_type<tc>, window_params = [{transform_indices = @transform_0, window_bounds = array<i64: 2, 128>}, {transform_indices = @transform_1, window_bounds = array<i64: 2, 128>}, {pipeline_mode = #tpu.pipeline_mode<synchronous>, transform_indices = @transform_2, window_bounds = array<i64: 20, 2>}, {pipeline_mode = #tpu.pipeline_mode<synchronous>, transform_indices = @transform_3, window_bounds = array<i64: 20, 2>}, {pipeline_mode = #tpu.pipeline_mode<synchronous>, transform_indices = @transform_4, window_bounds = array<i64: 20, 1>}, {pipeline_mode = #tpu.pipeline_mode<synchronous>, transform_indices = @transform_5, window_bounds = array<i64: 20, 20>}, {pipeline_mode = #tpu.pipeline_mode<synchronous>, transform_indices = @transform_6, window_bounds = array<i64: 20, 1>}, {pipeline_mode = #tpu.pipeline_mode<synchronous>, transform_indices = @transform_7, window_bounds = array<i64: 2, 20>}, {pipeline_mode = #tpu.pipeline_mode<synchronous>, transform_indices = @transform_8, window_bounds = array<i64: 2, 1>}, {transform_indices = @transform_9, window_bounds = array<i64: 2, 128>}]} {
    %c0 = arith.constant 0 : index
    %c0_0 = arith.constant 0 : index
    %0 = vector.load %arg3[%c0, %c0_0] : memref<20x2xf32, #tpu.memory_space<vmem>>, vector<20x2xf32>
    %c0_1 = arith.constant 0 : index
    %c0_2 = arith.constant 0 : index
    %1 = vector.load %arg4[%c0_1, %c0_2] : memref<20x2xf32, #tpu.memory_space<vmem>>, vector<20x2xf32>
    %c0_3 = arith.constant 0 : index
    %c0_4 = arith.constant 0 : index
    %2 = vector.load %arg5[%c0_3, %c0_4] : memref<20x1xf32, #tpu.memory_space<vmem>>, vector<20x1xf32>
    %c0_5 = arith.constant 0 : index
    %c0_6 = arith.constant 0 : index
    %3 = vector.load %arg6[%c0_5, %c0_6] : memref<20x20xbf16, #tpu.memory_space<vmem>>, vector<20x20xbf16>
    %c0_7 = arith.constant 0 : index
    %c0_8 = arith.constant 0 : index
    %4 = vector.load %arg7[%c0_7, %c0_8] : memref<20x1xf32, #tpu.memory_space<vmem>>, vector<20x1xf32>
    %c0_9 = arith.constant 0 : index
    %c0_10 = arith.constant 0 : index
    %5 = vector.load %arg8[%c0_9, %c0_10] : memref<2x20xf32, #tpu.memory_space<vmem>>, vector<2x20xf32>
    %c0_11 = arith.constant 0 : index
    %c0_12 = arith.constant 0 : index
    %6 = vector.load %arg9[%c0_11, %c0_12] : memref<2x1xf32, #tpu.memory_space<vmem>>, vector<2x1xf32>
    %c0_13 = arith.constant 0 : index
    %c0_14 = arith.constant 0 : index
    %7 = vector.load %arg1[%c0_13, %c0_14] : memref<2x128xf32, #tpu.memory_space<vmem>>, vector<2x128xf32>
    %c0_15 = arith.constant 0 : index
    %c0_16 = arith.constant 0 : index
    %8 = vector.load %arg2[%c0_15, %c0_16] : memref<2x128xf32, #tpu.memory_space<vmem>>, vector<2x128xf32>
    %9 = vector.extract_strided_slice %0 {offsets = [0, 0], sizes = [20, 1], strides = [1, 1]} : vector<20x2xf32> to vector<20x1xf32>
    %10 = vector.extract_strided_slice %7 {offsets = [0, 0], sizes = [1, 128], strides = [1, 1]} : vector<2x128xf32> to vector<1x128xf32>
    %11 = vector.broadcast %9 : vector<20x1xf32> to vector<20x128xf32>
    %12 = vector.broadcast %10 : vector<1x128xf32> to vector<20x128xf32>
    %13 = arith.mulf %11, %12 : vector<20x128xf32>
    %14 = vector.extract_strided_slice %0 {offsets = [0, 1], sizes = [20, 1], strides = [1, 1]} : vector<20x2xf32> to vector<20x1xf32>
    %15 = vector.extract_strided_slice %7 {offsets = [1, 0], sizes = [1, 128], strides = [1, 1]} : vector<2x128xf32> to vector<1x128xf32>
    %16 = vector.broadcast %14 : vector<20x1xf32> to vector<20x128xf32>
    %17 = vector.broadcast %15 : vector<1x128xf32> to vector<20x128xf32>
    %18 = arith.mulf %16, %17 : vector<20x128xf32>
    %19 = arith.addf %13, %18 : vector<20x128xf32>
    %20 = vector.extract_strided_slice %1 {offsets = [0, 0], sizes = [20, 1], strides = [1, 1]} : vector<20x2xf32> to vector<20x1xf32>
    %21 = vector.extract_strided_slice %8 {offsets = [0, 0], sizes = [1, 128], strides = [1, 1]} : vector<2x128xf32> to vector<1x128xf32>
    %22 = vector.broadcast %20 : vector<20x1xf32> to vector<20x128xf32>
    %23 = vector.broadcast %21 : vector<1x128xf32> to vector<20x128xf32>
    %24 = arith.mulf %22, %23 : vector<20x128xf32>
    %25 = arith.addf %19, %24 : vector<20x128xf32>
    %26 = vector.extract_strided_slice %1 {offsets = [0, 1], sizes = [20, 1], strides = [1, 1]} : vector<20x2xf32> to vector<20x1xf32>
    %27 = vector.extract_strided_slice %8 {offsets = [1, 0], sizes = [1, 128], strides = [1, 1]} : vector<2x128xf32> to vector<1x128xf32>
    %28 = vector.broadcast %26 : vector<20x1xf32> to vector<20x128xf32>
    %29 = vector.broadcast %27 : vector<1x128xf32> to vector<20x128xf32>
    %30 = arith.mulf %28, %29 : vector<20x128xf32>
    %31 = arith.addf %25, %30 : vector<20x128xf32>
    %32 = vector.broadcast %2 : vector<20x1xf32> to vector<20x128xf32>
    %33 = arith.addf %31, %32 : vector<20x128xf32>
    %cst = arith.constant 0.000000e+00 : f32
    %34 = vector.broadcast %cst : f32 to vector<20x128xf32>
    %35 = arith.maximumf %33, %34 : vector<20x128xf32>
    %36 = arith.truncf %35 : vector<20x128xf32> to vector<20x128xbf16>
    %cst_17 = arith.constant dense<0.000000e+00> : vector<20x128xf32>
    %37 = tpu.matmul %3, %36, %cst_17 {dimension_numbers = #tpu.dot_dimension_numbers<[1], [0], [0], [1], [0, 0, 1, 1], [], []>} : vector<20x20xbf16>, vector<20x128xbf16>, vector<20x128xf32> -> vector<20x128xf32>
    %38 = vector.broadcast %4 : vector<20x1xf32> to vector<20x128xf32>
    %39 = arith.addf %37, %38 : vector<20x128xf32>
    %cst_18 = arith.constant 0.000000e+00 : f32
    %40 = vector.broadcast %cst_18 : f32 to vector<20x128xf32>
    %41 = arith.maximumf %39, %40 : vector<20x128xf32>
    %42 = vector.extract_strided_slice %5 {offsets = [0, 0], sizes = [2, 1], strides = [1, 1]} : vector<2x20xf32> to vector<2x1xf32>
    %43 = vector.extract_strided_slice %41 {offsets = [0, 0], sizes = [1, 128], strides = [1, 1]} : vector<20x128xf32> to vector<1x128xf32>
    %44 = vector.broadcast %42 : vector<2x1xf32> to vector<2x128xf32>
    %45 = vector.broadcast %43 : vector<1x128xf32> to vector<2x128xf32>
    %46 = arith.mulf %44, %45 : vector<2x128xf32>
    %47 = vector.extract_strided_slice %5 {offsets = [0, 1], sizes = [2, 1], strides = [1, 1]} : vector<2x20xf32> to vector<2x1xf32>
    %48 = vector.extract_strided_slice %41 {offsets = [1, 0], sizes = [1, 128], strides = [1, 1]} : vector<20x128xf32> to vector<1x128xf32>
    %49 = vector.broadcast %47 : vector<2x1xf32> to vector<2x128xf32>
    %50 = vector.broadcast %48 : vector<1x128xf32> to vector<2x128xf32>
    %51 = arith.mulf %49, %50 : vector<2x128xf32>
    %52 = arith.addf %46, %51 : vector<2x128xf32>
    %53 = vector.extract_strided_slice %5 {offsets = [0, 2], sizes = [2, 1], strides = [1, 1]} : vector<2x20xf32> to vector<2x1xf32>
    %54 = vector.extract_strided_slice %41 {offsets = [2, 0], sizes = [1, 128], strides = [1, 1]} : vector<20x128xf32> to vector<1x128xf32>
    %55 = vector.broadcast %53 : vector<2x1xf32> to vector<2x128xf32>
    %56 = vector.broadcast %54 : vector<1x128xf32> to vector<2x128xf32>
    %57 = arith.mulf %55, %56 : vector<2x128xf32>
    %58 = arith.addf %52, %57 : vector<2x128xf32>
    %59 = vector.extract_strided_slice %5 {offsets = [0, 3], sizes = [2, 1], strides = [1, 1]} : vector<2x20xf32> to vector<2x1xf32>
    %60 = vector.extract_strided_slice %41 {offsets = [3, 0], sizes = [1, 128], strides = [1, 1]} : vector<20x128xf32> to vector<1x128xf32>
    %61 = vector.broadcast %59 : vector<2x1xf32> to vector<2x128xf32>
    %62 = vector.broadcast %60 : vector<1x128xf32> to vector<2x128xf32>
    %63 = arith.mulf %61, %62 : vector<2x128xf32>
    %64 = arith.addf %58, %63 : vector<2x128xf32>
    %65 = vector.extract_strided_slice %5 {offsets = [0, 4], sizes = [2, 1], strides = [1, 1]} : vector<2x20xf32> to vector<2x1xf32>
    %66 = vector.extract_strided_slice %41 {offsets = [4, 0], sizes = [1, 128], strides = [1, 1]} : vector<20x128xf32> to vector<1x128xf32>
    %67 = vector.broadcast %65 : vector<2x1xf32> to vector<2x128xf32>
    %68 = vector.broadcast %66 : vector<1x128xf32> to vector<2x128xf32>
    %69 = arith.mulf %67, %68 : vector<2x128xf32>
    %70 = arith.addf %64, %69 : vector<2x128xf32>
    %71 = vector.extract_strided_slice %5 {offsets = [0, 5], sizes = [2, 1], strides = [1, 1]} : vector<2x20xf32> to vector<2x1xf32>
    %72 = vector.extract_strided_slice %41 {offsets = [5, 0], sizes = [1, 128], strides = [1, 1]} : vector<20x128xf32> to vector<1x128xf32>
    %73 = vector.broadcast %71 : vector<2x1xf32> to vector<2x128xf32>
    %74 = vector.broadcast %72 : vector<1x128xf32> to vector<2x128xf32>
    %75 = arith.mulf %73, %74 : vector<2x128xf32>
    %76 = arith.addf %70, %75 : vector<2x128xf32>
    %77 = vector.extract_strided_slice %5 {offsets = [0, 6], sizes = [2, 1], strides = [1, 1]} : vector<2x20xf32> to vector<2x1xf32>
    %78 = vector.extract_strided_slice %41 {offsets = [6, 0], sizes = [1, 128], strides = [1, 1]} : vector<20x128xf32> to vector<1x128xf32>
    %79 = vector.broadcast %77 : vector<2x1xf32> to vector<2x128xf32>
    %80 = vector.broadcast %78 : vector<1x128xf32> to vector<2x128xf32>
    %81 = arith.mulf %79, %80 : vector<2x128xf32>
    %82 = arith.addf %76, %81 : vector<2x128xf32>
    %83 = vector.extract_strided_slice %5 {offsets = [0, 7], sizes = [2, 1], strides = [1, 1]} : vector<2x20xf32> to vector<2x1xf32>
    %84 = vector.extract_strided_slice %41 {offsets = [7, 0], sizes = [1, 128], strides = [1, 1]} : vector<20x128xf32> to vector<1x128xf32>
    %85 = vector.broadcast %83 : vector<2x1xf32> to vector<2x128xf32>
    %86 = vector.broadcast %84 : vector<1x128xf32> to vector<2x128xf32>
    %87 = arith.mulf %85, %86 : vector<2x128xf32>
    %88 = arith.addf %82, %87 : vector<2x128xf32>
    %89 = vector.extract_strided_slice %5 {offsets = [0, 8], sizes = [2, 1], strides = [1, 1]} : vector<2x20xf32> to vector<2x1xf32>
    %90 = vector.extract_strided_slice %41 {offsets = [8, 0], sizes = [1, 128], strides = [1, 1]} : vector<20x128xf32> to vector<1x128xf32>
    %91 = vector.broadcast %89 : vector<2x1xf32> to vector<2x128xf32>
    %92 = vector.broadcast %90 : vector<1x128xf32> to vector<2x128xf32>
    %93 = arith.mulf %91, %92 : vector<2x128xf32>
    %94 = arith.addf %88, %93 : vector<2x128xf32>
    %95 = vector.extract_strided_slice %5 {offsets = [0, 9], sizes = [2, 1], strides = [1, 1]} : vector<2x20xf32> to vector<2x1xf32>
    %96 = vector.extract_strided_slice %41 {offsets = [9, 0], sizes = [1, 128], strides = [1, 1]} : vector<20x128xf32> to vector<1x128xf32>
    %97 = vector.broadcast %95 : vector<2x1xf32> to vector<2x128xf32>
    %98 = vector.broadcast %96 : vector<1x128xf32> to vector<2x128xf32>
    %99 = arith.mulf %97, %98 : vector<2x128xf32>
    %100 = arith.addf %94, %99 : vector<2x128xf32>
    %101 = vector.extract_strided_slice %5 {offsets = [0, 10], sizes = [2, 1], strides = [1, 1]} : vector<2x20xf32> to vector<2x1xf32>
    %102 = vector.extract_strided_slice %41 {offsets = [10, 0], sizes = [1, 128], strides = [1, 1]} : vector<20x128xf32> to vector<1x128xf32>
    %103 = vector.broadcast %101 : vector<2x1xf32> to vector<2x128xf32>
    %104 = vector.broadcast %102 : vector<1x128xf32> to vector<2x128xf32>
    %105 = arith.mulf %103, %104 : vector<2x128xf32>
    %106 = arith.addf %100, %105 : vector<2x128xf32>
    %107 = vector.extract_strided_slice %5 {offsets = [0, 11], sizes = [2, 1], strides = [1, 1]} : vector<2x20xf32> to vector<2x1xf32>
    %108 = vector.extract_strided_slice %41 {offsets = [11, 0], sizes = [1, 128], strides = [1, 1]} : vector<20x128xf32> to vector<1x128xf32>
    %109 = vector.broadcast %107 : vector<2x1xf32> to vector<2x128xf32>
    %110 = vector.broadcast %108 : vector<1x128xf32> to vector<2x128xf32>
    %111 = arith.mulf %109, %110 : vector<2x128xf32>
    %112 = arith.addf %106, %111 : vector<2x128xf32>
    %113 = vector.extract_strided_slice %5 {offsets = [0, 12], sizes = [2, 1], strides = [1, 1]} : vector<2x20xf32> to vector<2x1xf32>
    %114 = vector.extract_strided_slice %41 {offsets = [12, 0], sizes = [1, 128], strides = [1, 1]} : vector<20x128xf32> to vector<1x128xf32>
    %115 = vector.broadcast %113 : vector<2x1xf32> to vector<2x128xf32>
    %116 = vector.broadcast %114 : vector<1x128xf32> to vector<2x128xf32>
    %117 = arith.mulf %115, %116 : vector<2x128xf32>
    %118 = arith.addf %112, %117 : vector<2x128xf32>
    %119 = vector.extract_strided_slice %5 {offsets = [0, 13], sizes = [2, 1], strides = [1, 1]} : vector<2x20xf32> to vector<2x1xf32>
    %120 = vector.extract_strided_slice %41 {offsets = [13, 0], sizes = [1, 128], strides = [1, 1]} : vector<20x128xf32> to vector<1x128xf32>
    %121 = vector.broadcast %119 : vector<2x1xf32> to vector<2x128xf32>
    %122 = vector.broadcast %120 : vector<1x128xf32> to vector<2x128xf32>
    %123 = arith.mulf %121, %122 : vector<2x128xf32>
    %124 = arith.addf %118, %123 : vector<2x128xf32>
    %125 = vector.extract_strided_slice %5 {offsets = [0, 14], sizes = [2, 1], strides = [1, 1]} : vector<2x20xf32> to vector<2x1xf32>
    %126 = vector.extract_strided_slice %41 {offsets = [14, 0], sizes = [1, 128], strides = [1, 1]} : vector<20x128xf32> to vector<1x128xf32>
    %127 = vector.broadcast %125 : vector<2x1xf32> to vector<2x128xf32>
    %128 = vector.broadcast %126 : vector<1x128xf32> to vector<2x128xf32>
    %129 = arith.mulf %127, %128 : vector<2x128xf32>
    %130 = arith.addf %124, %129 : vector<2x128xf32>
    %131 = vector.extract_strided_slice %5 {offsets = [0, 15], sizes = [2, 1], strides = [1, 1]} : vector<2x20xf32> to vector<2x1xf32>
    %132 = vector.extract_strided_slice %41 {offsets = [15, 0], sizes = [1, 128], strides = [1, 1]} : vector<20x128xf32> to vector<1x128xf32>
    %133 = vector.broadcast %131 : vector<2x1xf32> to vector<2x128xf32>
    %134 = vector.broadcast %132 : vector<1x128xf32> to vector<2x128xf32>
    %135 = arith.mulf %133, %134 : vector<2x128xf32>
    %136 = arith.addf %130, %135 : vector<2x128xf32>
    %137 = vector.extract_strided_slice %5 {offsets = [0, 16], sizes = [2, 1], strides = [1, 1]} : vector<2x20xf32> to vector<2x1xf32>
    %138 = vector.extract_strided_slice %41 {offsets = [16, 0], sizes = [1, 128], strides = [1, 1]} : vector<20x128xf32> to vector<1x128xf32>
    %139 = vector.broadcast %137 : vector<2x1xf32> to vector<2x128xf32>
    %140 = vector.broadcast %138 : vector<1x128xf32> to vector<2x128xf32>
    %141 = arith.mulf %139, %140 : vector<2x128xf32>
    %142 = arith.addf %136, %141 : vector<2x128xf32>
    %143 = vector.extract_strided_slice %5 {offsets = [0, 17], sizes = [2, 1], strides = [1, 1]} : vector<2x20xf32> to vector<2x1xf32>
    %144 = vector.extract_strided_slice %41 {offsets = [17, 0], sizes = [1, 128], strides = [1, 1]} : vector<20x128xf32> to vector<1x128xf32>
    %145 = vector.broadcast %143 : vector<2x1xf32> to vector<2x128xf32>
    %146 = vector.broadcast %144 : vector<1x128xf32> to vector<2x128xf32>
    %147 = arith.mulf %145, %146 : vector<2x128xf32>
    %148 = arith.addf %142, %147 : vector<2x128xf32>
    %149 = vector.extract_strided_slice %5 {offsets = [0, 18], sizes = [2, 1], strides = [1, 1]} : vector<2x20xf32> to vector<2x1xf32>
    %150 = vector.extract_strided_slice %41 {offsets = [18, 0], sizes = [1, 128], strides = [1, 1]} : vector<20x128xf32> to vector<1x128xf32>
    %151 = vector.broadcast %149 : vector<2x1xf32> to vector<2x128xf32>
    %152 = vector.broadcast %150 : vector<1x128xf32> to vector<2x128xf32>
    %153 = arith.mulf %151, %152 : vector<2x128xf32>
    %154 = arith.addf %148, %153 : vector<2x128xf32>
    %155 = vector.extract_strided_slice %5 {offsets = [0, 19], sizes = [2, 1], strides = [1, 1]} : vector<2x20xf32> to vector<2x1xf32>
    %156 = vector.extract_strided_slice %41 {offsets = [19, 0], sizes = [1, 128], strides = [1, 1]} : vector<20x128xf32> to vector<1x128xf32>
    %157 = vector.broadcast %155 : vector<2x1xf32> to vector<2x128xf32>
    %158 = vector.broadcast %156 : vector<1x128xf32> to vector<2x128xf32>
    %159 = arith.mulf %157, %158 : vector<2x128xf32>
    %160 = arith.addf %154, %159 : vector<2x128xf32>
    %161 = vector.broadcast %6 : vector<2x1xf32> to vector<2x128xf32>
    %162 = arith.addf %160, %161 : vector<2x128xf32>
    %c0_19 = arith.constant 0 : index
    %c0_20 = arith.constant 0 : index
    %163 = vector.load %arg10[%c0_19, %c0_20] : memref<2x128xf32, #tpu.memory_space<vmem>>, vector<2x128xf32>
    tpu.vector_store %arg10[%c0_19, %c0_20], %162 {strides = array<i32>} : memref<2x128xf32, #tpu.memory_space<vmem>>, vector<2x128xf32>,
    return
  }
  func.func @transform_0(%arg0: i32) -> (i32, i32) {
    %c0_i32 = arith.constant 0 : i32
    %c0_i32_0 = arith.constant 0 : i32
    return %c0_i32, %arg0 : i32, i32
  }
  func.func @transform_1(%arg0: i32) -> (i32, i32) {
    %c0_i32 = arith.constant 0 : i32
    %c0_i32_0 = arith.constant 0 : i32
    return %c0_i32, %arg0 : i32, i32
  }
  func.func @transform_2(%arg0: i32) -> (i32, i32) {
    %c0_i32 = arith.constant 0 : i32
    %c0_i32_0 = arith.constant 0 : i32
    %c0_i32_1 = arith.constant 0 : i32
    return %c0_i32, %c0_i32_0 : i32, i32
  }
  func.func @transform_3(%arg0: i32) -> (i32, i32) {
    %c0_i32 = arith.constant 0 : i32
    %c0_i32_0 = arith.constant 0 : i32
    %c0_i32_1 = arith.constant 0 : i32
    return %c0_i32, %c0_i32_0 : i32, i32
  }
  func.func @transform_4(%arg0: i32) -> (i32, i32) {
    %c0_i32 = arith.constant 0 : i32
    %c0_i32_0 = arith.constant 0 : i32
    %c0_i32_1 = arith.constant 0 : i32
    return %c0_i32, %c0_i32_0 : i32, i32
  }
  func.func @transform_5(%arg0: i32) -> (i32, i32) {
    %c0_i32 = arith.constant 0 : i32
    %c0_i32_0 = arith.constant 0 : i32
    %c0_i32_1 = arith.constant 0 : i32
    return %c0_i32, %c0_i32_0 : i32, i32
  }
  func.func @transform_6(%arg0: i32) -> (i32, i32) {
    %c0_i32 = arith.constant 0 : i32
    %c0_i32_0 = arith.constant 0 : i32
    %c0_i32_1 = arith.constant 0 : i32
    return %c0_i32, %c0_i32_0 : i32, i32
  }
  func.func @transform_7(%arg0: i32) -> (i32, i32) {
    %c0_i32 = arith.constant 0 : i32
    %c0_i32_0 = arith.constant 0 : i32
    %c0_i32_1 = arith.constant 0 : i32
    return %c0_i32, %c0_i32_0 : i32, i32
  }
  func.func @transform_8(%arg0: i32) -> (i32, i32) {
    %c0_i32 = arith.constant 0 : i32
    %c0_i32_0 = arith.constant 0 : i32
    %c0_i32_1 = arith.constant 0 : i32
    return %c0_i32, %c0_i32_0 : i32, i32
  }
  func.func @transform_9(%arg0: i32) -> (i32, i32) {
    %c0_i32 = arith.constant 0 : i32
    %c0_i32_0 = arith.constant 0 : i32
    return %c0_i32, %arg0 : i32, i32
  }
}

</mosaic_0001>

<bundles_post_ra>
// kernel: brnet_forward.1
= control target key start
LH: loop header
LB: loop body
LE: loop exit
PB: predicated region body
PF: predicated region fallthrough
CT: control target
= control target key end

     0   :  { %v422_v0 = vmov 1   ;;  %v423_v1 = vmov 0   ;;  %v424_v14 = vmov 2   ;;  %v425_v15 = vmov 4   ;;  %s583_s3 = inlined_call_operand.vmem [shape: f32[20,2], index: 3, kind: input, shape index: {}]   ;;  %s584_s2 = inlined_call_operand.vmem [shape: f32[20,2], index: 2, kind: input, shape index: {}]   ;;  %s585_s4 = inlined_call_operand.vmem [shape: f32[20,1], index: 4, kind: input, shape index: {}]   ;;  %s586_s6 = inlined_call_operand.vmem [shape: f32[20,1], index: 6, kind: input, shape index: {}]   ;;  %s587_s7 = inlined_call_operand.vmem [shape: f32[2,20], index: 7, kind: input, shape index: {}]   ;;  %s588_s0 = inlined_call_operand.vmem [shape: f32[2,128], index: 0, kind: input, shape index: {}]   ;;  %s589_s1 = inlined_call_operand.vmem [shape: f32[2,128], index: 1, kind: input, shape index: {}]   ;;  %s590_s5 = inlined_call_operand.vmem [shape: bf16[20,20], index: 5, kind: input, shape index: {}]   ;;  %s591_s8 = inlined_call_operand.vmem [shape: f32[2,1], index: 8, kind: input, shape index: {}]   ;;  %s592_s9 = inlined_call_operand.vmem [shape: f32[2,128], index: 9, kind: output, shape index: {}]  }
   0x1   :  { %389 = vset.pattern.permute.xlu0 %v422_v0  ;;  %391 = vset.pattern.permute.xlu1 %v423_v1  ;;  %v38_v2 = vld [vmem:[%s583_s3 + $0x10] sm:$0xf]  ;;  %v33_v4 = vld [vmem:[%s584_s2] sm:$0xff]  ;;  %v34_v5 = vld [vmem:[%s584_s2 + $0x8] sm:$0xff]  ;;  %v426_v18 = vmov 7   ;;  %v427_v22 = vmov 9  }
   0x2   :  { %v35_v3 = vld [vmem:[%s584_s2 + $0x10] sm:$0xf]  ;;  %102 = vperm.xlu1 %391, %v38_v2   ;;  %393 = vset.pattern.permute.xlu2 %v423_v1  ;;  %v36_v6 = vld [vmem:[%s583_s3] sm:$0xff]  ;;  %v37_v8 = vld [vmem:[%s583_s3 + $0x8] sm:$0xff]  ;;  %v428_v27 = vmov 3   ;;  %v429_v35 = vmov 12  }
   0x3   :  { %80 = vperm.xlu0 %389, %v35_v3   ;;  %54 = vperm.xlu2 %393, %v33_v4   ;;  %v39_v7 = vld [vmem:[%s585_s4] sm:$0xff]  ;;  %v41_v9 = vld [vmem:[%s585_s4 + $0x10] sm:$0xf]  ;;  %v46_v10 = vld [vmem:[%s586_s6 + $0x8] sm:$0xff]  ;;  %v430_v42 = vmov 5   ;;  %v431_v46 = vmov 6  }
   0x4   :  { %v40_v11 = vld [vmem:[%s585_s4 + $0x8] sm:$0xff]  ;;  %v47_v12 = vld [vmem:[%s586_s6 + $0x10] sm:$0xf]  ;;  %v535_v13 = vld [vmem:[%s587_s7] sm:$0x3]  ;;  %v432_v47 = vmov 14  }
   0x5   :  { %v45_v17 = vld [vmem:[%s586_s6] sm:$0xff]  ;;  %vm184_vm0 = vcmask 1041408   ;;  %v433_v51 = vmov 8   ;;  %v434_v53 = vmov 11   ;;  %v435_v54 = vmov 17  }
   0x6   :  { %v50_v23 = vld [vmem:[%s588_s0] sm:$0x3]  ;;  %v436_v63 = vmov 10   ;;  %vm177_vm1 = vcmask 162816  }
   0x7   :  { %v51_v24 = vld [vmem:[%s589_s1] sm:$0x3]  ;;  %v83_v25 = vperm.slane %v50_v23, 1  ;;  %v67_v28 = vperm.slane %v50_v23, 0 }
   0x8   :  { %v105_v29 = vperm.slane %v51_v24, 0  ;;  %v124_v33 = vperm.slane %v51_v24, 1  ;;  %v440_v24 = vmov 15  }
   0xa   :  { %392 = vset.pattern.permute.xlu1 %v422_v0 }
   0xb   :  { %390 = vset.pattern.permute.xlu0 %v423_v1  ;;  %121 = vperm.xlu1 %392, %v38_v2  }
   0xc   :  { %64 = vperm.xlu0 %390, %v35_v3   ;;  %59 = vperm.xlu2 %393, %v34_v5  }
  0x13   :  { %72 = vperm.xlu1 %392, %v33_v4  }
  0x14   :  { %92 = vperm.xlu0 %390, %v36_v6   ;;  %394 = vset.pattern.permute.xlu2 %v422_v0 }
  0x15   :  { %76 = vperm.xlu2 %394, %v34_v5   ;;  %v437_v5 = vmov 16  }
  0x1b   :  { %395 = vset.pattern.permute.xlu1 %v423_v1 }
  0x1c   :  { %133 = vperm.xlu0 %390, %v39_v7   ;;  %97 = vperm.xlu1 %395, %v37_v8  }
  0x1d   :  { %396 = vset.pattern.permute.xlu2 %v423_v1 }
  0x1e   :  { %143 = vperm.xlu2 %396, %v41_v9  }
  0x24   :  { %161 = vperm.xlu0 %390, %v46_v10   ;;  %397 = vset.pattern.permute.xlu1 %v422_v0 }
  0x25   :  { %113 = vperm.xlu1 %397, %v36_v6   ;;  %v438_v6 = vmov 19  }
  0x26   :  { %398 = vset.pattern.permute.xlu2 %v422_v0 }
  0x27   :  { %117 = vperm.xlu2 %398, %v37_v8  }
  0x2c   :  { %401 = vset.pattern.permute.xlu0 %v422_v0 }
  0x2d   :  { %399 = vset.pattern.permute.xlu1 %v423_v1  ;;  %217 = vperm.xlu0 %401, %v535_v13  }
  0x2e   :  { %138 = vperm.xlu1 %399, %v40_v11  }
  0x2f   :  { %400 = vset.pattern.permute.xlu2 %v423_v1 }
  0x30   :  { %156 = vperm.xlu2 %400, %v45_v17  }
  0x35   :  { %406 = vset.pattern.permute.xlu0 %v431_v46 }
  0x36   :  { %166 = vperm.xlu1 %399, %v47_v12   ;;  %252 = vperm.xlu0 %406, %v535_v13  }
  0x38   :  { %211 = vperm.xlu2 %400, %v535_v13  }
  0x3e   :  { %402 = vset.pattern.permute.xlu1 %v424_v14  ;;  %411 = vset.pattern.permute.xlu0 %v434_v53  ;;  %v44_v14 = vld [vmem:[%s590_s5 + $0x8] sm:$0x3] }
  0x3f   :  { %224 = vperm.xlu1 %402, %v535_v13   ;;  %287 = vperm.xlu0 %411, %v535_v13  }
  0x40   :  { %403 = vset.pattern.permute.xlu2 %v428_v27 }
  0x41   :  { %231 = vperm.xlu2 %403, %v535_v13  }
  0x47   :  { %404 = vset.pattern.permute.xlu1 %v425_v15  ;;  %416 = vset.pattern.permute.xlu0 %v437_v5 }
  0x48   :  { %238 = vperm.xlu1 %404, %v535_v13   ;;  %322 = vperm.xlu0 %416, %v535_v13  }
  0x49   :  { %405 = vset.pattern.permute.xlu2 %v430_v42 }
  0x4a   :  { %245 = vperm.xlu2 %405, %v535_v13  }
  0x50   :  { %407 = vset.pattern.permute.xlu1 %v426_v18  ;;  %v174_v18 = vunpack.c.l.b16 %v44_v14  ;;  %421 = vset.pattern.permute.xlu0 %v423_v1 }
  0x51   :  { %259 = vperm.xlu1 %407, %v535_v13  }
  0x52   :  { %408 = vset.pattern.permute.xlu2 %v433_v51  ;;  %v176_v23 = vpack.c.b16 %v174_v18, %v174_v18 }
  0x53   :  { %266 = vperm.xlu2 %408, %v535_v13  }
  0x59   :  { %409 = vset.pattern.permute.xlu1 %v427_v22  ;;  %v366_v22 = vld [vmem:[%s590_s5] sm:$0xff] }
  0x5a   :  { %273 = vperm.xlu1 %409, %v535_v13  }
  0x5b   :  { %410 = vset.pattern.permute.xlu2 %v436_v63 }
  0x5c   :  { %280 = vperm.xlu2 %410, %v535_v13  }
  0x5d   :  { %v540_v16 = vpop.permute.xlu2 %54 }
  0x5e   :  { %v68_v55 = vmul.f32 %v67_v28, %v540_v16  ;;  %v439_v16 = vmov 13  }
  0x62   :  { %412 = vset.pattern.permute.xlu1 %v429_v35 }
  0x63   :  { %294 = vperm.xlu1 %412, %v535_v13  }
  0x64   :  { %413 = vset.pattern.permute.xlu2 %v439_v16 }
  0x65   :  { %301 = vperm.xlu2 %413, %v535_v13  }
  0x66   :  { %v60_v19 = vpop.permute.xlu2 %59 }
  0x67   :  { %v69_v57 = vmul.f32 %v67_v28, %v60_v19 }
  0x6b   :  { %414 = vset.pattern.permute.xlu1 %v432_v47 }
  0x6c   :  { %308 = vperm.xlu1 %414, %v535_v13  }
  0x6d   :  { %415 = vset.pattern.permute.xlu2 %v440_v24 }
  0x6e   :  { %315 = vperm.xlu2 %415, %v535_v13  }
  0x6f   :  { %v77_v26 = vpop.permute.xlu2 %76 }
  0x70   :  { %v85_v58 = vmul.f32 %v83_v25, %v77_v26  ;;  %v49_v26 = vld [vmem:[%s591_s8] sm:$0x3] }
  0x72   :  { %v88_v3 = vadd.f32 %v85_v58, %v69_v57 }
  0x74   :  { %v103_v20 = vpop.permute.xlu1 %102  ;;  %417 = vset.pattern.permute.xlu1 %v435_v54 }
  0x75   :  { %v81_v21 = vpop.permute.xlu0 %80  ;;  %v108_v36 = vmul.f32 %v105_v29, %v103_v20  ;;  %329 = vperm.xlu1 %417, %v535_v13  }
  0x76   :  { %v86_v30 = vmul.f32 %v83_v25, %v81_v21 }
  0x78   :  { %v144_v40 = vpop.permute.xlu2 %143 }
  0x7d   :  { %v122_v31 = vpop.permute.xlu1 %121  ;;  %419 = vset.pattern.permute.xlu1 %v438_v6 }
  0x7e   :  { %v65_v32 = vpop.permute.xlu0 %64  ;;  %v127_v38 = vmul.f32 %v124_v33, %v122_v31  ;;  %343 = vperm.xlu1 %419, %v535_v13  }
  0x7f   :  { %v70_v34 = vmul.f32 %v67_v28, %v65_v32 }
  0x81   :  { %v89_v37 = vadd.f32 %v86_v30, %v70_v34  ;;  %v118_v0 = vpop.permute.xlu2 %117 }
  0x82   :  { %v126_v8 = vmul.f32 %v124_v33, %v118_v0 }
  0x83   :  { %v111_v39 = vadd.f32 %v108_v36, %v89_v37 }
  0x85   :  { %v130_v41 = vadd.f32 %v127_v38, %v111_v39  ;;  %v73_v43 = vpop.permute.xlu1 %72 }
  0x86   :  { %v84_v52 = vmul.f32 %v83_v25, %v73_v43  ;;  %v93_v56 = vpop.permute.xlu0 %92  ;;  %v441_v25 = vmov 18  }
  0x87   :  { %v148_v44 = vadd.f32 %v144_v40, %v130_v41  ;;  %v106_v59 = vmul.f32 %v105_v29, %v93_v56  ;;  %418 = vset.pattern.permute.xlu2 %v441_v25 }
  0x88   :  { %v87_v60 = vadd.f32 %v84_v52, %v68_v55  ;;  %336 = vperm.xlu2 %418, %v535_v13  }
  0x89   :  { %v151_v45 = vmax.f32 %v148_v44, 0.0 }
  0x8a   :  { %v109_v4 = vadd.f32 %v106_v59, %v87_v60  ;;  %v157_v27 = vpop.permute.xlu2 %156 }
  0x8b   :  { %v153_v48 = vpack.c.bf16 %v151_v45, %v151_v45 }
  0x8d   :  { %v186_v49 = vsel %vm184_vm0, %v153_v48, 0 }
  0x8e   :  { %194 = vmatpush.bf16.msra.mxu0 %v186_v49  ;;  %367 = vmatpush.bf16.msra.mxu1 %v186_v49  ;;  %v98_v50 = vpop.permute.xlu1 %97  ;;  %v134_v10 = vpop.permute.xlu0 %133 }
  0x8f   :  { %v107_v61 = vmul.f32 %v105_v29, %v98_v50 }
  0x90   :  { %420 = vset.pattern.permute.xlu2 %v423_v1 }
  0x91   :  { %v110_v7 = vadd.f32 %v107_v61, %v88_v3  ;;  %351 = vperm.xlu2 %420, %v49_v26  }
  0x92   :  { %v212_v29 = vpop.permute.xlu2 %211 }
  0x93   :  { %v129_v11 = vadd.f32 %v126_v8, %v110_v7 }
  0x96   :  { %v162_v35 = vpop.permute.xlu0 %161 }
  0x97   :  { %v114_v62 = vpop.permute.xlu1 %113 }
  0x98   :  { %v125_v2 = vmul.f32 %v124_v33, %v114_v62 }
  0x9a   :  { %v128_v9 = vadd.f32 %v125_v2, %v109_v4 }
  0x9b   :  { %v232_v31 = vpop.permute.xlu2 %231 }
  0x9c   :  { %v146_v12 = vadd.f32 %v134_v10, %v128_v9 }
  0x9e   :  { %v149_v20 = vmax.f32 %v146_v12, 0.0 }
  0x9f   :  { %v218_v41 = vpop.permute.xlu0 %217 }
  0xa0   :  { %v139_v15 = vpop.permute.xlu1 %138 }
  0xa1   :  { %v147_v17 = vadd.f32 %v139_v15, %v129_v11 }
  0xa3   :  { %v150_v19 = vmax.f32 %v147_v17, 0.0 }
  0xa4   :  { %v246_v33 = vpop.permute.xlu2 %245 }
  0xa5   :  { %v152_v21 = vpack.c.bf16 %v150_v19, %v149_v20 }
  0xa7   :  { %195 = vmatpush.bf16.msra.mxu0 %v152_v21  ;;  %368 = vmatpush.bf16.msra.mxu1 %v152_v21 }
  0xa8   :  { %v167_v28 = vpop.permute.xlu1 %166  ;;  %v253_v62 = vpop.permute.xlu0 %252 }
  0xaa   :  { %364 = vmatmul.msk.bf16.vlgmr.msra.gmra.mxu0 %vm177_vm1, %v366_v22  ;;  %365 = vmatmul.msk.bf16.vlgmr.msra.gmra.mxu1 %vm177_vm1, %v176_v23 }
  0xad   :  { %v267_v36 = vpop.permute.xlu2 %266 }
  0xb1   :  { %v225_v30 = vpop.permute.xlu1 %224  ;;  %v288_v18 = vpop.permute.xlu0 %287 }
  0xb6   :  { %v281_v44 = vpop.permute.xlu2 %280 }
  0xba   :  { %v239_v32 = vpop.permute.xlu1 %238 }
  0xbf   :  { %v302_v3 = vpop.permute.xlu2 %301 }
  0xc3   :  { %v260_v34 = vpop.permute.xlu1 %259 }
  0xc8   :  { %v316_v23 = vpop.permute.xlu2 %315 }
  0xcc   :  { %v274_v37 = vpop.permute.xlu1 %273 }
  0xd5   :  { %v295_v54 = vpop.permute.xlu1 %294 }
  0xde   :  { %v309_v10 = vpop.permute.xlu1 %308 }
 0x127   :  { %v197_v38 = vpop.f32.mrf.mxu0  ;;  %v202_v13 = vpop.f32.mrf.mxu1 }
 0x128   :  { %v198_v39 = vadd.f32 %v197_v38, %v157_v27  ;;  %v203_v19 = vadd.f32 %v202_v13, %v167_v28 }
 0x12a   :  { %v206_v40 = vmax.f32 %v198_v39, 0.0  ;;  %v208_v27 = vmax.f32 %v203_v19, 0.0  ;;  %v323_v39 = vpop.permute.xlu0 %322 }
 0x12c   :  { %v214_v42 = vperm.slane %v206_v40, 0  ;;  %v220_v43 = vperm.slane %v206_v40, 1  ;;  %v227_v1 = vperm.slane %v206_v40, 2  ;;  %v234_v47 = vperm.slane %v206_v40, 3 }
 0x12d   :  { %v241_v52 = vperm.slane %v206_v40, 4  ;;  %v248_v56 = vperm.slane %v206_v40, 5  ;;  %v255_v61 = vperm.slane %v206_v40, 6  ;;  %v262_v2 = vperm.slane %v206_v40, 7 }
 0x12e   :  { %v215_v45 = vmul.f32 %v214_v42, %v212_v29  ;;  %v221_v46 = vmul.f32 %v220_v43, %v218_v41  ;;  %v228_v51 = vmul.f32 %v227_v1, %v225_v30  ;;  %v235_v55 = vmul.f32 %v234_v47, %v232_v31  ;;  %v337_v41 = vpop.permute.xlu2 %336 }
 0x12f   :  { %v199_v48 = vpop.f32.mrf.mxu0  ;;  %v204_v49 = vpop.f32.mrf.mxu1  ;;  %v242_v60 = vmul.f32 %v241_v52, %v239_v32  ;;  %v249_v0 = vmul.f32 %v248_v56, %v246_v33  ;;  %v256_v5 = vmul.f32 %v255_v61, %v253_v62  ;;  %v263_v8 = vmul.f32 %v262_v2, %v260_v34 }
 0x130   :  { %v222_v50 = vadd.f32 %v221_v46, %v215_v45  ;;  %v200_v53 = vadd.f32 %v199_v48, %v162_v35  ;;  %v330_v32 = vpop.permute.xlu1 %329  ;;  %v332_v28 = vperm.slane %v208_v27, 1  ;;  %v339_v43 = vperm.slane %v208_v27, 2 }
 0x132   :  { %v229_v57 = vadd.f32 %v228_v51, %v222_v50  ;;  %v207_v58 = vmax.f32 %v200_v53, 0.0  ;;  %v333_v46 = vmul.f32 %v332_v28, %v330_v32  ;;  %v340_v48 = vmul.f32 %v339_v43, %v337_v41 }
 0x134   :  { %v236_v59 = vadd.f32 %v235_v55, %v229_v57  ;;  %v269_v6 = vperm.slane %v207_v58, 0  ;;  %v276_v9 = vperm.slane %v207_v58, 1  ;;  %v283_v14 = vperm.slane %v207_v58, 2 }
 0x135   :  { %v290_v17 = vperm.slane %v207_v58, 3  ;;  %v297_v22 = vperm.slane %v207_v58, 4  ;;  %v304_v26 = vperm.slane %v207_v58, 5  ;;  %v311_v31 = vperm.slane %v207_v58, 6 }
 0x136   :  { %v243_v63 = vadd.f32 %v242_v60, %v236_v59  ;;  %v270_v12 = vmul.f32 %v269_v6, %v267_v36  ;;  %v277_v16 = vmul.f32 %v276_v9, %v274_v37  ;;  %v284_v21 = vmul.f32 %v283_v14, %v281_v44  ;;  %v352_v52 = vpop.permute.xlu2 %351 }
 0x137   :  { %v291_v25 = vmul.f32 %v290_v17, %v288_v18  ;;  %v298_v30 = vmul.f32 %v297_v22, %v295_v54  ;;  %v305_v34 = vmul.f32 %v304_v26, %v302_v3  ;;  %v318_v35 = vperm.slane %v207_v58, 7 }
 0x138   :  { %v250_v4 = vadd.f32 %v249_v0, %v243_v63  ;;  %v325_v36 = vperm.slane %v208_v27, 0  ;;  %v312_v38 = vmul.f32 %v311_v31, %v309_v10  ;;  %v346_v44 = vperm.slane %v208_v27, 3  ;;  %v344_v47 = vpop.permute.xlu1 %343 }
 0x139   :  { %v319_v40 = vmul.f32 %v318_v35, %v316_v23 }
 0x13a   :  { %v257_v7 = vadd.f32 %v256_v5, %v250_v4  ;;  %v326_v42 = vmul.f32 %v325_v36, %v323_v39  ;;  %v347_v50 = vmul.f32 %v346_v44, %v344_v47 }
 0x13c   :  { %v264_v11 = vadd.f32 %v263_v8, %v257_v7 }
 0x13e   :  { %v271_v15 = vadd.f32 %v270_v12, %v264_v11 }
 0x140   :  { %v278_v20 = vadd.f32 %v277_v16, %v271_v15 }
 0x142   :  { %v285_v24 = vadd.f32 %v284_v21, %v278_v20 }
 0x144   :  { %v292_v29 = vadd.f32 %v291_v25, %v285_v24 }
 0x146   :  { %v299_v33 = vadd.f32 %v298_v30, %v292_v29 }
 0x148   :  { %v306_v37 = vadd.f32 %v305_v34, %v299_v33 }
 0x14a   :  { %v313_v13 = vadd.f32 %v312_v38, %v306_v37 }
 0x14c   :  { %v320_v1 = vadd.f32 %v319_v40, %v313_v13 }
 0x14e   :  { %v327_v45 = vadd.f32 %v326_v42, %v320_v1 }
 0x150   :  { %v334_v49 = vadd.f32 %v333_v46, %v327_v45 }
 0x152   :  { %v341_v51 = vadd.f32 %v340_v48, %v334_v49 }
 0x154   :  { %v348_v53 = vadd.f32 %v347_v50, %v341_v51 }
 0x156   :  { %v354_v54 = vadd.f32 %v352_v52, %v348_v53 }
 0x158   :  { %355 = vst [vmem:[%s592_s9] sm:$0x3] %v354_v54 }

</bundles_post_ra>
